<compile_context>
chip_gen: v6e
topology: v6e:2x2x1
jax: 0.10.0
libtpu: 0.0.40
codegen_flags: <defaults>
</compile_context>

<pallas_src>
import functools

import jax
import jax.numpy as jnp
from jax import lax
from jax.experimental import pallas as pl
from jax.experimental.pallas import tpu as pltpu

_LANE = 128
_SUBLANE = 8
_NEG_BIG = -1e30  # finite "-inf": exp underflows to exactly 0.0


def _round_up(n, m):
    return (n + m - 1) // m * m


# ---------------------------------------------------------------------------
# One-time parameter preparation (hoisted out of the per-call path).
# ---------------------------------------------------------------------------
def prepare_params(params):
    """params: list of (W:(in,out) f32, b:(1,out) f32).

    Returns padded, MXU-ready tensors:
      W -> (in_pad, out_pad) bf16, zero padded to 128-lane multiples
      b -> (1, out_pad)      f32
    Zero padding keeps the padded matmuls mathematically identical.
    """
    prepared = []
    for w, b in params:
        in_p = _round_up(w.shape[0], _LANE)
        out_p = _round_up(w.shape[1], _LANE)
        w_p = jnp.zeros((in_p, out_p), jnp.bfloat16)
        w_p = w_p.at[: w.shape[0], : w.shape[1]].set(w.astype(jnp.bfloat16))
        b2 = jnp.reshape(b, (1, -1)).astype(jnp.float32)
        b_p = jnp.zeros((1, out_p), jnp.float32).at[:, : b2.shape[1]].set(b2)
        prepared.append((w_p, b_p))
    return prepared


# ---------------------------------------------------------------------------
# Pass 1: gridded MLP -> final-layer logits + online dim=0 max / exp-sum.
# ---------------------------------------------------------------------------
def _mlp_logits_kernel(*refs, num_layers, tile_batch, valid_batch, padded_batch):
    """refs = (x, w0, b0, ..., w_{L-1}, b_{L-1}, z_out, m_out, s_out).

    x:     (TB, D0_pad)         bf16, VMEM tile of the batch
    w_l:   (Dl_pad, D_{l+1}_pad) bf16, VMEM-resident (same block every step)
    b_l:   (1, D_{l+1}_pad)      f32,  VMEM-resident
    z_out: (TB, out_pad)         f32 logits tile (lane-dense)
    m_out: (1, out_pad)          f32 running column max   (resident accumulator)
    s_out: (1, out_pad)          f32 running column exp-sum (resident accumulator)
    """
    x_ref = refs[0]
    z_ref, m_ref, s_ref = refs[-3], refs[-2], refs[-1]
    i = pl.program_id(0)

    @pl.when(i == 0)
    def _():
        m_ref[...] = jnp.full_like(m_ref, _NEG_BIG)
        s_ref[...] = jnp.zeros_like(s_ref)

    act = x_ref[...]                                       # bf16 (TB, D0_pad)
    z = None
    for l in range(num_layers):
        w = refs[1 + 2 * l][...]                           # bf16
        b = refs[2 + 2 * l][...]                           # f32
        # bf16 x bf16 on the MXU, f32 accumulation.
        z = jnp.dot(act, w, preferred_element_type=jnp.float32) + b
        if l < num_layers - 1:
            # F.relu; carry activations as bf16 between layers.
            act = jnp.maximum(z, 0.0).astype(jnp.bfloat16)

    # Mask padded batch rows so they contribute exactly 0 to the dim=0 softmax.
    if padded_batch != valid_batch:
        row = i * tile_batch + lax.broadcasted_iota(jnp.int32, z.shape, 0)
        z = jnp.where(row < valid_batch, z, _NEG_BIG)

    # Online (streaming) max / exp-sum across the batch grid axis.
    m_old = m_ref[...]
    m_new = jnp.maximum(m_old, jnp.max(z, axis=0, keepdims=True))
    s_ref[...] = s_ref[...] * jnp.exp(m_old - m_new) + jnp.sum(
        jnp.exp(z - m_new), axis=0, keepdims=True)
    m_ref[...] = m_new
    z_ref[...] = z


# ---------------------------------------------------------------------------
# Pass 2: normalize  out = exp(z - m) / s   (per batch tile, fully parallel).
# ---------------------------------------------------------------------------
def _softmax_normalize_kernel(z_ref, m_ref, s_ref, o_ref):
    # Exact divide: s is a single (1, out_pad) vector, the EUP approx path
    # would buy nothing here and only loosens the probabilities.
    o_ref[...] = (jnp.exp(z_ref[...] - m_ref[...]) / s_ref[...]).astype(o_ref.dtype)


# ---------------------------------------------------------------------------
# Forward wrapper.
# ---------------------------------------------------------------------------
@functools.partial(jax.jit, static_argnames=("out_features", "tile_batch"))
def mlp_forward(x, prepared, *, out_features, tile_batch=256):
    """x: (batch, Layers[0]) f32; prepared: output of prepare_params()."""
    batch, d0 = x.shape
    num_layers = len(prepared)

    d0_pad = _round_up(d0, _LANE)
    out_pad = prepared[-1][0].shape[1]

    # Batch tile: multiple of 8 sublanes; >=256 rows fills the v6e/v7x MXU
    # when the batch allows it.  Tiny enough to fit v7x's 32 MiB scoped VMEM
    # with double-buffered input/output tiles + resident bf16 weights.
    tb = _round_up(min(tile_batch, _round_up(batch, _SUBLANE)), _SUBLANE)
    b_pad = _round_up(batch, tb)
    n_tiles = b_pad // tb

    # Pad + cast the input once, as bf16 (halves input DMA bytes).
    x_p = jnp.zeros((b_pad, d0_pad), jnp.bfloat16)
    x_p = x_p.at[:batch, :d0].set(x.astype(jnp.bfloat16))

    flat_args = [x_p]
    in_specs = [pl.BlockSpec((tb, d0_pad), lambda i: (i, 0))]
    for w_p, b_p in prepared:
        flat_args += [w_p, b_p]
        in_specs.append(pl.BlockSpec(w_p.shape, lambda i: (0, 0)))  # resident
        in_specs.append(pl.BlockSpec(b_p.shape, lambda i: (0, 0)))  # resident

    flops = 2 * b_pad * sum(int(w.shape[0]) * int(w.shape[1]) for w, _ in prepared)
    bytes_in = (x_p.size * 2
                + sum(int(w.size) * 2 + int(b.size) * 4 for w, b in prepared))
    bytes_out = b_pad * out_pad * 4 + 2 * out_pad * 4

    kernel1 = functools.partial(
        _mlp_logits_kernel,
        num_layers=num_layers,
        tile_batch=tb,
        valid_batch=batch,
        padded_batch=b_pad,
    )

    logits, m, s = pl.pallas_call(
        kernel1,
        grid=(n_tiles,),
        in_specs=in_specs,
        out_specs=(
            pl.BlockSpec((tb, out_pad), lambda i: (i, 0)),
            pl.BlockSpec((1, out_pad), lambda i: (0, 0)),
            pl.BlockSpec((1, out_pad), lambda i: (0, 0)),
        ),
        out_shape=(
            jax.ShapeDtypeStruct((b_pad, out_pad), jnp.float32),
            jax.ShapeDtypeStruct((1, out_pad), jnp.float32),
            jax.ShapeDtypeStruct((1, out_pad), jnp.float32),
        ),
        compiler_params=pltpu.CompilerParams(
            dimension_semantics=("arbitrary",)),   # online softmax stats carry
        cost_estimate=pl.CostEstimate(
            flops=flops,
            transcendentals=2 * b_pad * out_pad,
            bytes_accessed=bytes_in + bytes_out),
    )(*flat_args)

    out_p = pl.pallas_call(
        _softmax_normalize_kernel,
        grid=(n_tiles,),
        in_specs=[
            pl.BlockSpec((tb, out_pad), lambda i: (i, 0)),
            pl.BlockSpec((1, out_pad), lambda i: (0, 0)),
            pl.BlockSpec((1, out_pad), lambda i: (0, 0)),
        ],
        out_specs=pl.BlockSpec((tb, out_pad), lambda i: (i, 0)),
        out_shape=jax.ShapeDtypeStruct((b_pad, out_pad), jnp.float32),
        compiler_params=pltpu.CompilerParams(
            dimension_semantics=("parallel",)),    # normalize: megacore-able
        cost_estimate=pl.CostEstimate(
            flops=3 * b_pad * out_pad,
            transcendentals=b_pad * out_pad,
            bytes_accessed=2 * b_pad * out_pad * 4 + 2 * out_pad * 4),
    )(logits, m, s)

    # Lane-dense padded output; slice to the logical (batch, out_features).
    return out_p[:batch, :out_features]


# ---------------------------------------------------------------------------
# Init + reference.
# ---------------------------------------------------------------------------
def init_params(key, layers):
    """Deterministic PyTorch-style (uniform +/- 1/sqrt(fan_in)) init, f32."""
    params = []
    for in_size, out_size in zip(layers, layers[1:]):
        key, kw, kb = jax.random.split(key, 3)
        bound = 1.0 / jnp.sqrt(jnp.float32(in_size))
        # nn.Linear stores (out, in); we keep it pre-transposed to (in, out).
        w = jax.random.uniform(kw, (in_size, out_size), jnp.float32, -bound, bound)
        b = jax.random.uniform(kb, (1, out_size), jnp.float32, -bound, bound)
        params.append((w, b))
    return params


def reference_forward(x, params):
    """Pure-JAX replica emulating the kernel numerics (bf16 operands and
    bf16-carried activations, f32 accumulation) so the comparison is tight."""
    act = x.astype(jnp.bfloat16)
    L = len(params)
    for l, (w, b) in enumerate(params):
        z = jnp.dot(act, w.astype(jnp.bfloat16),
                    preferred_element_type=jnp.float32) + jnp.reshape(b, (1, -1))
        if l < L - 1:
            act = jnp.maximum(z, 0.0).astype(jnp.bfloat16)
        else:
            act = jax.nn.softmax(z, axis=0)    # dim=0, as in the PyTorch code
    return act


if __name__ == "__main__":
    # Small shapes consistent with the module: MLP with Layers=[32, 64, 10].
    # batch=20 with tile_batch=8 -> 3 batch tiles, 4 masked padding rows:
    # exercises the gridded pipeline, the online dim=0 softmax and row masking.
    layers = [32, 64, 10]
    batch = 20
    tile_batch = 8

    key = jax.random.PRNGKey(0)
    key, kx = jax.random.split(key)
    x = jax.random.normal(kx, (batch, layers[0]), jnp.float32)
    params = init_params(key, layers)

    prepared = prepare_params(params)          # one-time weight prep (hoisted)

    out = mlp_forward(x, prepared, out_features=layers[-1], tile_batch=tile_batch)
    out = jax.block_until_ready(out)

    ref = reference_forward(x, params)
    assert out.shape == (batch, layers[-1])
    assert bool(jnp.allclose(out, ref, atol=1e-3, rtol=1e-3)), (
        "max abs err = %g" % float(jnp.max(jnp.abs(out - ref))))
    # dim=0 softmax: every output column sums to 1 across the batch.
    assert bool(jnp.allclose(out.sum(axis=0), jnp.ones((layers[-1],)), atol=1e-3))

    print("KERNEL_OK")
</pallas_src>

<mosaic_0001>
module attributes {stable_mosaic.version = 11 : i64} {
  func.func @_softmax_normalize_kernel(%arg0: i32, %arg1: memref<8x128xf32, #tpu.memory_space<vmem>>, %arg2: memref<1x128xf32, #tpu.memory_space<vmem>>, %arg3: memref<1x128xf32, #tpu.memory_space<vmem>>, %arg4: memref<8x128xf32, #tpu.memory_space<vmem>>) attributes {dimension_semantics = [#tpu.dimension_semantics<parallel>], iteration_bounds = array<i64: 3>, scalar_prefetch = 0 : i64, scratch_operands = 0 : i64, tpu.core_type = #tpu.core_type<tc>, window_params = [{transform_indices = @transform_0, window_bounds = array<i64: 8, 128>}, {pipeline_mode = #tpu.pipeline_mode<synchronous>, transform_indices = @transform_1, window_bounds = array<i64: 1, 128>}, {pipeline_mode = #tpu.pipeline_mode<synchronous>, transform_indices = @transform_2, window_bounds = array<i64: 1, 128>}, {transform_indices = @transform_3, window_bounds = array<i64: 8, 128>}]} {
    %c0 = arith.constant 0 : index
    %c0_0 = arith.constant 0 : index
    %0 = vector.load %arg1[%c0, %c0_0] : memref<8x128xf32, #tpu.memory_space<vmem>>, vector<8x128xf32>
    %c0_1 = arith.constant 0 : index
    %c0_2 = arith.constant 0 : index
    %1 = vector.load %arg2[%c0_1, %c0_2] : memref<1x128xf32, #tpu.memory_space<vmem>>, vector<1x128xf32>
    %2 = vector.broadcast %1 : vector<1x128xf32> to vector<8x128xf32>
    %3 = arith.subf %0, %2 : vector<8x128xf32>
    %4 = math.exp %3 : vector<8x128xf32>
    %c0_3 = arith.constant 0 : index
    %c0_4 = arith.constant 0 : index
    %5 = vector.load %arg3[%c0_3, %c0_4] : memref<1x128xf32, #tpu.memory_space<vmem>>, vector<1x128xf32>
    %6 = vector.broadcast %5 : vector<1x128xf32> to vector<8x128xf32>
    %7 = arith.divf %4, %6 : vector<8x128xf32>
    %c0_5 = arith.constant 0 : index
    %c0_6 = arith.constant 0 : index
    %8 = vector.load %arg4[%c0_5, %c0_6] : memref<8x128xf32, #tpu.memory_space<vmem>>, vector<8x128xf32>
    tpu.vector_store %arg4[%c0_5, %c0_6], %7 {strides = array<i32>} : memref<8x128xf32, #tpu.memory_space<vmem>>, vector<8x128xf32>,
    return
  }
  func.func @transform_0(%arg0: i32) -> (i32, i32) {
    %c0_i32 = arith.constant 0 : i32
    %c0_i32_0 = arith.constant 0 : i32
    return %arg0, %c0_i32 : i32, i32
  }
  func.func @transform_1(%arg0: i32) -> (i32, i32) {
    %c0_i32 = arith.constant 0 : i32
    %c0_i32_0 = arith.constant 0 : i32
    %c0_i32_1 = arith.constant 0 : i32
    return %c0_i32, %c0_i32_0 : i32, i32
  }
  func.func @transform_2(%arg0: i32) -> (i32, i32) {
    %c0_i32 = arith.constant 0 : i32
    %c0_i32_0 = arith.constant 0 : i32
    %c0_i32_1 = arith.constant 0 : i32
    return %c0_i32, %c0_i32_0 : i32, i32
  }
  func.func @transform_3(%arg0: i32) -> (i32, i32) {
    %c0_i32 = arith.constant 0 : i32
    %c0_i32_0 = arith.constant 0 : i32
    return %arg0, %c0_i32 : i32, i32
  }
}

module attributes {stable_mosaic.version = 11 : i64} {
  func.func @_mlp_logits_kernel(%arg0: i32, %arg1: memref<8x128xbf16, #tpu.memory_space<vmem>>, %arg2: memref<128x128xbf16, #tpu.memory_space<vmem>>, %arg3: memref<1x128xf32, #tpu.memory_space<vmem>>, %arg4: memref<128x128xbf16, #tpu.memory_space<vmem>>, %arg5: memref<1x128xf32, #tpu.memory_space<vmem>>, %arg6: memref<8x128xf32, #tpu.memory_space<vmem>>, %arg7: memref<1x128xf32, #tpu.memory_space<vmem>>, %arg8: memref<1x128xf32, #tpu.memory_space<vmem>>) attributes {dimension_semantics = [#tpu.dimension_semantics<arbitrary>], iteration_bounds = array<i64: 3>, scalar_prefetch = 0 : i64, scratch_operands = 0 : i64, tpu.core_type = #tpu.core_type<tc>, window_params = [{transform_indices = @transform_0, window_bounds = array<i64: 8, 128>}, {pipeline_mode = #tpu.pipeline_mode<synchronous>, transform_indices = @transform_1, window_bounds = array<i64: 128, 128>}, {pipeline_mode = #tpu.pipeline_mode<synchronous>, transform_indices = @transform_2, window_bounds = array<i64: 1, 128>}, {pipeline_mode = #tpu.pipeline_mode<synchronous>, transform_indices = @transform_3, window_bounds = array<i64: 128, 128>}, {pipeline_mode = #tpu.pipeline_mode<synchronous>, transform_indices = @transform_4, window_bounds = array<i64: 1, 128>}, {transform_indices = @transform_5, window_bounds = array<i64: 8, 128>}, {pipeline_mode = #tpu.pipeline_mode<synchronous>, transform_indices = @transform_6, window_bounds = array<i64: 1, 128>}, {pipeline_mode = #tpu.pipeline_mode<synchronous>, transform_indices = @transform_7, window_bounds = array<i64: 1, 128>}]} {
    %c0_i32 = arith.constant 0 : i32
    %0 = arith.cmpi eq, %arg0, %c0_i32 : i32
    %1 = arith.extui %0 : i1 to i32
    %c0_i32_0 = arith.constant 0 : i32
    %2 = arith.cmpi ne, %1, %c0_i32_0 : i32
    scf.if %2 {
      %cst_25 = arith.constant -1.000000e+30 : f32
      %42 = vector.broadcast %cst_25 : f32 to vector<1x128xf32>
      %c0_26 = arith.constant 0 : index
      %c0_27 = arith.constant 0 : index
      %43 = vector.load %arg7[%c0_26, %c0_27] : memref<1x128xf32, #tpu.memory_space<vmem>>, vector<1x128xf32>
      tpu.vector_store %arg7[%c0_26, %c0_27], %42 {strides = array<i32>} : memref<1x128xf32, #tpu.memory_space<vmem>>, vector<1x128xf32>,
      %cst_28 = arith.constant 0.000000e+00 : f32
      %44 = vector.broadcast %cst_28 : f32 to vector<1x128xf32>
      %c0_29 = arith.constant 0 : index
      %c0_30 = arith.constant 0 : index
      %45 = vector.load %arg8[%c0_29, %c0_30] : memref<1x128xf32, #tpu.memory_space<vmem>>, vector<1x128xf32>
      tpu.vector_store %arg8[%c0_29, %c0_30], %44 {strides = array<i32>} : memref<1x128xf32, #tpu.memory_space<vmem>>, vector<1x128xf32>,
    } else {
    }
    %c0 = arith.constant 0 : index
    %c0_1 = arith.constant 0 : index
    %3 = vector.load %arg1[%c0, %c0_1] : memref<8x128xbf16, #tpu.memory_space<vmem>>, vector<8x128xbf16>
    %c0_2 = arith.constant 0 : index
    %c0_3 = arith.constant 0 : index
    %4 = vector.load %arg2[%c0_2, %c0_3] : memref<128x128xbf16, #tpu.memory_space<vmem>>, vector<128x128xbf16>
    %c0_4 = arith.constant 0 : index
    %c0_5 = arith.constant 0 : index
    %5 = vector.load %arg3[%c0_4, %c0_5] : memref<1x128xf32, #tpu.memory_space<vmem>>, vector<1x128xf32>
    %cst = arith.constant dense<0.000000e+00> : vector<8x128xf32>
    %6 = tpu.matmul %3, %4, %cst {dimension_numbers = #tpu.dot_dimension_numbers<[1], [0], [0], [1], [0, 0, 1, 1], [], []>} : vector<8x128xbf16>, vector<128x128xbf16>, vector<8x128xf32> -> vector<8x128xf32>
    %7 = vector.broadcast %5 : vector<1x128xf32> to vector<8x128xf32>
    %8 = arith.addf %6, %7 : vector<8x128xf32>
    %cst_6 = arith.constant 0.000000e+00 : f32
    %9 = vector.broadcast %cst_6 : f32 to vector<8x128xf32>
    %10 = arith.maximumf %8, %9 : vector<8x128xf32>
    %11 = arith.truncf %10 : vector<8x128xf32> to vector<8x128xbf16>
    %c0_7 = arith.constant 0 : index
    %c0_8 = arith.constant 0 : index
    %12 = vector.load %arg4[%c0_7, %c0_8] : memref<128x128xbf16, #tpu.memory_space<vmem>>, vector<128x128xbf16>
    %c0_9 = arith.constant 0 : index
    %c0_10 = arith.constant 0 : index
    %13 = vector.load %arg5[%c0_9, %c0_10] : memref<1x128xf32, #tpu.memory_space<vmem>>, vector<1x128xf32>
    %cst_11 = arith.constant dense<0.000000e+00> : vector<8x128xf32>
    %14 = tpu.matmul %11, %12, %cst_11 {dimension_numbers = #tpu.dot_dimension_numbers<[1], [0], [0], [1], [0, 0, 1, 1], [], []>} : vector<8x128xbf16>, vector<128x128xbf16>, vector<8x128xf32> -> vector<8x128xf32>
    %15 = vector.broadcast %13 : vector<1x128xf32> to vector<8x128xf32>
    %16 = arith.addf %14, %15 : vector<8x128xf32>
    %c8_i32 = arith.constant 8 : i32
    %17 = arith.muli %arg0, %c8_i32 : i32
    %18 = tpu.iota {dimensions = array<i32: 0>} : vector<8x128xi32>
    %19 = vector.broadcast %17 : i32 to vector<8x128xi32>
    %20 = arith.addi %19, %18 : vector<8x128xi32>
    %c20_i32 = arith.constant 20 : i32
    %21 = vector.broadcast %c20_i32 : i32 to vector<8x128xi32>
    %22 = arith.cmpi slt, %20, %21 : vector<8x128xi32>
    %cst_12 = arith.constant -1.000000e+30 : f32
    %23 = vector.broadcast %cst_12 : f32 to vector<8x128xf32>
    %24 = arith.select %22, %16, %23 : vector<8x128xi1>, vector<8x128xf32>
    %c0_13 = arith.constant 0 : index
    %c0_14 = arith.constant 0 : index
    %25 = vector.load %arg7[%c0_13, %c0_14] : memref<1x128xf32, #tpu.memory_space<vmem>>, vector<1x128xf32>
    %cst_15 = arith.constant dense<0xFF800000> : vector<128xf32>
    %26 = vector.multi_reduction <maximumf>, %24, %cst_15 [0] : vector<8x128xf32> to vector<128xf32>
    %27 = vector.shape_cast %26 : vector<128xf32> to vector<1x128xf32>
    %28 = arith.maximumf %25, %27 : vector<1x128xf32>
    %c0_16 = arith.constant 0 : index
    %c0_17 = arith.constant 0 : index
    %29 = vector.load %arg8[%c0_16, %c0_17] : memref<1x128xf32, #tpu.memory_space<vmem>>, vector<1x128xf32>
    %30 = arith.subf %25, %28 : vector<1x128xf32>
    %31 = math.exp %30 : vector<1x128xf32>
    %32 = arith.mulf %29, %31 : vector<1x128xf32>
    %33 = vector.broadcast %28 : vector<1x128xf32> to vector<8x128xf32>
    %34 = arith.subf %24, %33 : vector<8x128xf32>
    %35 = math.exp %34 : vector<8x128xf32>
    %cst_18 = arith.constant dense<0.000000e+00> : vector<128xf32>
    %36 = vector.multi_reduction <add>, %35, %cst_18 [0] : vector<8x128xf32> to vector<128xf32>
    %37 = vector.shape_cast %36 : vector<128xf32> to vector<1x128xf32>
    %38 = arith.addf %32, %37 : vector<1x128xf32>
    %c0_19 = arith.constant 0 : index
    %c0_20 = arith.constant 0 : index
    %39 = vector.load %arg8[%c0_19, %c0_20] : memref<1x128xf32, #tpu.memory_space<vmem>>, vector<1x128xf32>
    tpu.vector_store %arg8[%c0_19, %c0_20], %38 {strides = array<i32>} : memref<1x128xf32, #tpu.memory_space<vmem>>, vector<1x128xf32>,
    %c0_21 = arith.constant 0 : index
    %c0_22 = arith.constant 0 : index
    %40 = vector.load %arg7[%c0_21, %c0_22] : memref<1x128xf32, #tpu.memory_space<vmem>>, vector<1x128xf32>
    tpu.vector_store %arg7[%c0_21, %c0_22], %28 {strides = array<i32>} : memref<1x128xf32, #tpu.memory_space<vmem>>, vector<1x128xf32>,
    %c0_23 = arith.constant 0 : index
    %c0_24 = arith.constant 0 : index
    %41 = vector.load %arg6[%c0_23, %c0_24] : memref<8x128xf32, #tpu.memory_space<vmem>>, vector<8x128xf32>
    tpu.vector_store %arg6[%c0_23, %c0_24], %24 {strides = array<i32>} : memref<8x128xf32, #tpu.memory_space<vmem>>, vector<8x128xf32>,
    return
  }
  func.func @transform_0(%arg0: i32) -> (i32, i32) {
    %c0_i32 = arith.constant 0 : i32
    %c0_i32_0 = arith.constant 0 : i32
    return %arg0, %c0_i32 : i32, i32
  }
  func.func @transform_1(%arg0: i32) -> (i32, i32) {
    %c0_i32 = arith.constant 0 : i32
    %c0_i32_0 = arith.constant 0 : i32
    %c0_i32_1 = arith.constant 0 : i32
    return %c0_i32, %c0_i32_0 : i32, i32
  }
  func.func @transform_2(%arg0: i32) -> (i32, i32) {
    %c0_i32 = arith.constant 0 : i32
    %c0_i32_0 = arith.constant 0 : i32
    %c0_i32_1 = arith.constant 0 : i32
    return %c0_i32, %c0_i32_0 : i32, i32
  }
  func.func @transform_3(%arg0: i32) -> (i32, i32) {
    %c0_i32 = arith.constant 0 : i32
    %c0_i32_0 = arith.constant 0 : i32
    %c0_i32_1 = arith.constant 0 : i32
    return %c0_i32, %c0_i32_0 : i32, i32
  }
  func.func @transform_4(%arg0: i32) -> (i32, i32) {
    %c0_i32 = arith.constant 0 : i32
    %c0_i32_0 = arith.constant 0 : i32
    %c0_i32_1 = arith.constant 0 : i32
    return %c0_i32, %c0_i32_0 : i32, i32
  }
  func.func @transform_5(%arg0: i32) -> (i32, i32) {
    %c0_i32 = arith.constant 0 : i32
    %c0_i32_0 = arith.constant 0 : i32
    return %arg0, %c0_i32 : i32, i32
  }
  func.func @transform_6(%arg0: i32) -> (i32, i32) {
    %c0_i32 = arith.constant 0 : i32
    %c0_i32_0 = arith.constant 0 : i32
    %c0_i32_1 = arith.constant 0 : i32
    return %c0_i32, %c0_i32_0 : i32, i32
  }
  func.func @transform_7(%arg0: i32) -> (i32, i32) {
    %c0_i32 = arith.constant 0 : i32
    %c0_i32_0 = arith.constant 0 : i32
    %c0_i32_1 = arith.constant 0 : i32
    return %c0_i32, %c0_i32_0 : i32, i32
  }
}

</mosaic_0001>

<bundles_post_ra>
// kernel: mlp_forward.3
= control target key start
LH: loop header
LB: loop body
LE: loop exit
PB: predicated region body
PF: predicated region fallthrough
CT: control target
= control target key end

     0   :  { %s267_s12 = smov 0   ;;  %s303_s0 = inlined_call_operand.vmem [shape: f32[24,128], index: 0, kind: input, shape index: {}]   ;;  %s304_s1 = inlined_call_operand.vmem [shape: f32[1,128], index: 1, kind: input, shape index: {}]   ;;  %s305_s2 = inlined_call_operand.vmem [shape: f32[1,128], index: 2, kind: input, shape index: {}]   ;;  %s306_s3 = inlined_call_operand.vmem [shape: f32[24,128], index: 3, kind: output, shape index: {}]  }
   0x1 LB: > { %s240_s13 = sadd.s32 4294967295, %s269_s12   ;;  %p244_p0 = scmp.ge.s32.totalorder %s269_s12, 1  ;;  %s269_s12 = sphi %s267_s12, %s13_s12  }
   0x2   : > { %p136_p1 = scmp.lt.s32.totalorder %s269_s12, 4 }
   0x4   : > { %p137_p2 = pnand %p244_p0, %p136_p1 }
   0x5   : > { %p158_p3 = scmp.lt.s32.totalorder (!%p137_p2), %s240_s13, 2 }
   0x6   : > { %140 = sbr.rel (%p137_p2) target bundleno = 36 (0x24), region = 32 }
   0xb   : > { %s308_s13 = smov (!%p158_p3, %s240_s13), 2  ;;  %v247_v0 = vld [vmem:[%s304_s1] ss:$0 sm:$0xff] }
   0xc   : > { %s245_s14 = sshll.u32 %s308_s13, 3  ;;  %v248_v2 = vld [vmem:[%s305_s2] ss:$0 sm:$0xff] }
   0xd   : > { %s161_s19 = scalar_lea.vmem %s303_s0, %s245_s14  ;;  %259 = vrcp.f32 %v248_v2  ;;  %s165_s24 = scalar_lea.vmem %s306_s3, %s245_s14 }
   0xe   : > { %v166_v1 = vld [vmem:[%s161_s19] sm:$0xff] }
   0xf   : > { %v174_v3 = vsub.f32 %v166_v1, %v247_v0 }
  0x11   : > { %v175_v4 = vmul.f32 1.442695, %v174_v3 }
  0x13   : > { %261 = vpow2.f32 %v175_v4 }
  0x1a   : > { %v260_v5 = vpop.eup %259 }
  0x20   : > { %v262_v6 = vpop.eup %261 }
  0x21   : > { %v185_v7 = vmul.f32 %v262_v6, %v260_v5 }
  0x23   : > { %186 = vst [vmem:[%s165_s24] sm:$0xff] %v185_v7 }
  0x24 PF: > { %s13_s12 = sadd.s32 1, %s269_s12  }
  0x25   : > { %p10_p4 = scmp.ge.s32.totalorder %s13_s12, 5  }
  0x27   :  { %12 = sbr.rel (!%p10_p4) target bundleno = 1 (0x1), region = 62 }

// kernel: mlp_forward.2
= control target key start
LH: loop header
LB: loop body
LE: loop exit
PB: predicated region body
PF: predicated region fallthrough
CT: control target
= control target key end

     0   :  { %13 = vsyncpa [#allocation3], 0  ;;  %s851_s24 = smov 0   ;;  %s948_s0 = inlined_call_operand.vmem [shape: bf16[24,128], index: 0, kind: input, shape index: {}]   ;;  %s949_s1 = inlined_call_operand.hbm [shape: bf16[128,128], index: 1, kind: input, shape index: {}]   ;;  %s950_s2 = inlined_call_operand.vmem [shape: f32[1,128], index: 2, kind: input, shape index: {}]   ;;  %s951_s3 = inlined_call_operand.vmem [shape: bf16[128,128], index: 3, kind: input, shape index: {}]   ;;  %s952_s4 = inlined_call_operand.vmem [shape: f32[1,128], index: 4, kind: input, shape index: {}]   ;;  %s953_s5 = inlined_call_operand.vmem [shape: f32[24,128], index: 5, kind: output, shape index: {0}]   ;;  %s954_s6 = inlined_call_operand.vmem [shape: f32[1,128], index: 6, kind: output, shape index: {1}]   ;;  %s955_s7 = inlined_call_operand.vmem [shape: f32[1,128], index: 7, kind: output, shape index: {2}]  }
   0x1 LB: > { %s857_s25 = sadd.s32 4294967295, %s802_s24   ;;  %p634_p0 = scmp.ge.s32.totalorder %s802_s24, 1  ;;  %s802_s24 = sphi %s851_s24, %s19_s24  }
   0x2   : > { %p202_p1 = scmp.lt.s32.totalorder %s802_s24, 4  ;;  %s804_s26 = smov [#allocation2]  }
   0x3   : > { %s214_s27 = sshll.u32 %s804_s26, 4  ;;  %p729_p4 = scmp.eq.s32.totalorder %s857_s25, 0  ;;  %s215_s27 = int_to_ptr.vmem [resolvable:$true] %s214_s27 }
   0x4   : > { %p862_p3 = pnand %p634_p0, %p202_p1  ;;  %s777_s29 = scalar_lea.vmem %s215_s27, 1024 }
   0x5   : > { %p778_p8 = scmp.ne.s32.totalorder %s215_s27, %s777_s29  ;;  %p785_p11 = scmp.lt.s32.totalorder %s215_s27, %s215_s27 }
   0x6   : > { %p725_p5 = pneg %p862_p3  ;;  %p786_p12 = scmp.lt.s32.totalorder %s777_s29, %s777_s29 }
   0x8   : > { %p726_p6 = pnand %p729_p4, %p725_p5  ;;  %p787_p13 = por %p786_p12, %p785_p11 }
   0xa   : > { %p768_p7 = pneg %p726_p6 }
   0xc   : > { %p780_p9 = pnand %p778_p8, %p768_p7 }
   0xe   : > { %p781_p10 = pneg %p780_p9 }
  0x10   : > { %p788_p2 = pnand %p787_p13, %p781_p10 }
  0x12   : > { %791 = shalt.err (!%p788_p2)
}
  0x13   : > { %s805_s30 = smov 64   ;;  %s806_s8 = smov 4  }
  0x14   : > { %728 = dma.hbm_to_vmem [thread:$0]  (!%p726_p6), %s949_s1, 1024, %s215_s27, [#allocation3], %s805_s30, %s805_s30, %s806_s8  }
  0x15   : > { %246 = sbr.rel (%p862_p3) target bundleno = 514 (0x202), region = 40 }
  0x1a   : > { %797 = dma.done.wait (%p729_p4), [#allocation3], 1024  }
  0x1b   : > { %799 = vsyncadd (%p729_p4), [#allocation3], 4294966272  ;;  %p276_p0 = scmp.lt.s32.totalorder %s857_s25, 2  ;;  %p957_p1 = scmp.ne.s32.totalorder %s857_s25, 0 }
  0x1d   : > { %s277_s11 = scalar_select %p276_p0, %s857_s25, 2 }
  0x1e   : > { %288 = sbr.rel (%p957_p1) target bundleno = 37 (0x25), region = 48 }
  0x1f   : > { %s639_s12 = sshll.u32 %s277_s11, 2  ;;  %s640_s13 = sshll.u32 %s277_s11, 3 }
  0x20   : > { %s885_s16 = scalar_lea.vmem %s948_s0, %s639_s12  ;;  %s890_s19 = scalar_lea.vmem %s953_s5, %s640_s13 }
  0x23   : > { %v807_v0 = vmov -1e+30   ;;  %v808_v1 = vmov 0.0  }
  0x24   : > { %289 = vst [vmem:[%s954_s6] sm:$0x1] %v807_v0  ;;  %290 = vst [vmem:[%s955_s7] sm:$0x1] %v808_v1 }
  0x25 PF: > { %v746_v2 = vld [vmem:[#allocation2 + $0x38] sm:$0xff]   ;;  %v809_v3 = vmov 0.0   ;;  %v747_v4 = vld [vmem:[#allocation2 + $0x30] sm:$0xff]   ;;  %vm810_vm0 = vmmov 0   ;;  %v748_v5 = vld [vmem:[#allocation2 + $0x28] sm:$0xff]   ;;  %v517_v28 = vlaneseq }
  0x26   : > { %681 = vmatprep.subr.bf16.mxu0 %v809_v3  ;;  %701 = vmatprep.subr.bf16.mxu1 %v809_v3  ;;  %v754_v6 = vld [vmem:[%s951_s3 + $0x38] sm:$0xff]   ;;  %v749_v7 = vld [vmem:[#allocation2 + $0x20] sm:$0xff]   ;;  %v755_v8 = vld [vmem:[%s951_s3 + $0x30] sm:$0xff]  }
  0x27   : > { %682 = vmatpush3.bf16.msra.mxu0 %v746_v2  ;;  %697 = vmatprep.mubr.msk.bf16.mxu0 %vm810_vm0, %v809_v3  ;;  %v750_v9 = vld [vmem:[#allocation2 + $0x18] sm:$0xff]   ;;  %v756_v10 = vld [vmem:[%s951_s3 + $0x28] sm:$0xff]   ;;  %v751_v11 = vld [vmem:[#allocation2 + $0x10] sm:$0xff]   ;;  %v518_v29 = vshrl.u32 %v517_v28, 7 }
  0x28   : > { %683 = vmatprep.subr.bf16.mxu0 %v809_v3  ;;  %717 = vmatprep.mubr.msk.bf16.mxu1 %vm810_vm0, %v809_v3  ;;  %v757_v12 = vld [vmem:[%s951_s3 + $0x20] sm:$0xff]   ;;  %v752_v13 = vld [vmem:[#allocation2 + $0x8] sm:$0xff]   ;;  %v758_v14 = vld [vmem:[%s951_s3 + $0x18] sm:$0xff]  }
  0x29   : > { %702 = vmatpush3.bf16.msra.mxu1 %v754_v6  ;;  %v753_v15 = vld [vmem:[#allocation2] sm:$0xff]   ;;  %v759_v16 = vld [vmem:[%s951_s3 + $0x10] sm:$0xff]   ;;  %v760_v18 = vld [vmem:[%s951_s3 + $0x8] sm:$0xff]   ;;  %v539_v46 = vsub.s32 0, %v518_v29 }
  0x2a   : > { %703 = vmatprep.subr.bf16.mxu1 %v809_v3  ;;  %v291_v17 = vld [vmem:[%s885_s16] sm:$0xf]  ;;  %s660_s16 = sshll.u32 %s857_s25, 3 }
  0x2b   : > { %684 = vmatpush3.bf16.msra.mxu0 %v747_v4  ;;  %v761_v19 = vld [vmem:[%s951_s3] sm:$0xff]   ;;  %v519_v30 = vstv %s660_s16 }
  0x2c   : > { %685 = vmatprep.subr.bf16.mxu0 %v809_v3  ;;  %v642_v20 = vld [vmem:[%s950_s2] ss:$0 sm:$0xff]  ;;  %v520_v31 = vadd.s32 %v519_v30, %v518_v29 }
  0x2d   : > { %704 = vmatpush3.bf16.msra.mxu1 %v755_v8  ;;  %v651_v32 = vld [vmem:[%s952_s4] ss:$0 sm:$0xff] }
  0x2e   : > { %705 = vmatprep.subr.bf16.mxu1 %v809_v3  ;;  %vm521_vm1 = vcmp.lt.s32.totalorder %v520_v31, 20  ;;  %v523_v44 = vld [vmem:[%s954_s6] sm:$0x1] }
  0x2f   : > { %686 = vmatpush3.bf16.msra.mxu0 %v748_v5  ;;  %v531_v59 = vld [vmem:[%s955_s7] sm:$0x1] }
  0x30   : > { %687 = vmatprep.subr.bf16.mxu0 %v809_v3 }
  0x31   : > { %706 = vmatpush3.bf16.msra.mxu1 %v756_v10 }
  0x32   : > { %707 = vmatprep.subr.bf16.mxu1 %v809_v3 }
  0x33   : > { %688 = vmatpush3.bf16.msra.mxu0 %v749_v7 }
  0x34   : > { %689 = vmatprep.subr.bf16.mxu0 %v809_v3 }
  0x35   : > { %708 = vmatpush3.bf16.msra.mxu1 %v757_v12 }
  0x36   : > { %709 = vmatprep.subr.bf16.mxu1 %v809_v3 }
  0x37   : > { %690 = vmatpush3.bf16.msra.mxu0 %v750_v9 }
  0x38   : > { %691 = vmatprep.subr.bf16.mxu0 %v809_v3 }
  0x39   : > { %710 = vmatpush3.bf16.msra.mxu1 %v758_v14 }
  0x3a   : > { %711 = vmatprep.subr.bf16.mxu1 %v809_v3 }
  0x3b   : > { %692 = vmatpush3.bf16.msra.mxu0 %v751_v11 }
  0x3c   : > { %693 = vmatprep.subr.bf16.mxu0 %v809_v3 }
  0x3d   : > { %712 = vmatpush3.bf16.msra.mxu1 %v759_v16 }
  0x3e   : > { %713 = vmatprep.subr.bf16.mxu1 %v809_v3 }
  0x3f   : > { %694 = vmatpush3.bf16.msra.mxu0 %v752_v13 }
  0x40   : > { %695 = vmatprep.subr.bf16.mxu0 %v809_v3 }
  0x41   : > { %714 = vmatpush3.bf16.msra.mxu1 %v760_v18 }
  0x42   : > { %715 = vmatprep.subr.bf16.mxu1 %v809_v3 }
  0x43   : > { %696 = vmatpush3.bf16.msra.mxu0 %v753_v15 }
  0x45   : > { %716 = vmatpush3.bf16.msra.mxu1 %v761_v19 }
  0x46   : > { %698 = vmatmul.mubr.bf16.vlgmr.msra.gmra.mxu0 %v291_v17 }
 0x106   : > { %v397_v21 = vpop.f32.mrf.mxu0 }
 0x107   : > { %v398_v22 = vadd.f32 %v642_v20, %v397_v21 }
 0x108   : > { %v699_v23 = vpop.f32.mrf.mxu0 }
 0x109   : > { %v403_v24 = vmax.f32 %v398_v22, 0.0 }
 0x10a   : > { %v400_v25 = vpop.f32.mrf.mxu0 }
 0x10b   : > { %v404_v26 = vpack.c.bf16 %v403_v24, %v403_v24 }
 0x10c   : > { %v700_v27 = vpop.f32.mrf.mxu0 }
 0x10d   : > { %718 = vmatmul.mubr.bf16.vlgmr.msra.gmra.mxu1 %v404_v26 }
 0x1cd   : > { %v510_v33 = vpop.f32.mrf.mxu1 }
 0x1ce   : > { %v511_v34 = vadd.f32 %v651_v32, %v510_v33 }
 0x1cf   : > { %v719_v35 = vpop.f32.mrf.mxu1 }
 0x1d0   : > { %v522_v36 = vsel %vm521_vm1, %v511_v34, -1e+30 }
 0x1d1   : > { %v524_v37 = vrot.slane %v522_v36, 4  ;;  %554 = vst [vmem:[%s890_s19] sm:$0xff] %v522_v36  ;;  %v513_v38 = vpop.f32.mrf.mxu1 }
 0x1d3   : > { %v525_v39 = vmax.f32 %v522_v36, %v524_v37  ;;  %v720_v40 = vpop.f32.mrf.mxu1 }
 0x1d5   : > { %v526_v41 = vrot.slane %v525_v39, 2 }
 0x1d7   : > { %v527_v42 = vmax.f32 %v525_v39, %v526_v41 }
 0x1d9   : > { %v528_v43 = vrot.slane %v527_v42, 1 }
 0x1db   : > { %v529_v45 = vmax.f32 %v527_v42, %v528_v43 }
 0x1dd   : > { %v530_v47 = vmax.f32 %v523_v44, %v529_v45 }
 0x1df   : > { %v540_v48 = vrot.slane %v530_v47, %v539_v46  ;;  %553 = vst [vmem:[%s954_s6] sm:$0x1] %v530_v47  ;;  %v532_v51 = vsub.f32 %v523_v44, %v530_v47 }
 0x1e1   : > { %v542_v49 = vsub.f32 %v522_v36, %v540_v48  ;;  %v533_v52 = vmul.f32 1.442695, %v532_v51 }
 0x1e3   : > { %v543_v50 = vmul.f32 1.442695, %v542_v49 }
 0x1e5   : > { %762 = vpow2.f32 %v543_v50 }
 0x1e6   : > { %764 = vpow2.f32 %v533_v52 }
 0x1f2   : > { %v763_v53 = vpop.eup %762 }
 0x1f3   : > { %v545_v54 = vrot.slane %v763_v53, 4  ;;  %v765_v58 = vpop.eup %764 }
 0x1f4   : > { %v535_v61 = vmul.f32 %v765_v58, %v531_v59 }
 0x1f5   : > { %v546_v55 = vadd.f32 %v763_v53, %v545_v54 }
 0x1f7   : > { %v547_v56 = vrot.slane %v546_v55, 2 }
 0x1f9   : > { %v548_v57 = vadd.f32 %v547_v56, %v546_v55 }
 0x1fb   : > { %v549_v60 = vrot.slane %v548_v57, 1 }
 0x1fd   : > { %v550_v62 = vadd.f32 %v549_v60, %v548_v57 }
 0x1ff   : > { %v551_v63 = vadd.f32 %v550_v62, %v535_v61 }
 0x201   : > { %552 = vst [vmem:[%s955_s7] sm:$0x1] %v551_v63 }
 0x202 PF: > { %s19_s24 = sadd.s32 1, %s802_s24  }
 0x203   : > { %p16_p2 = scmp.ge.s32.totalorder %s19_s24, 5  }
 0x205   :  { %18 = sbr.rel (!%p16_p2) target bundleno = 1 (0x1), region = 95 }
 0x20a   :  { %586 = vsyncpa [#allocation3], 1 }
 0x20b   :  { %588 = vsyncpa [#allocation3 + $0x1], 1 }

</bundles_post_ra>
